<compile_context>
chip_gen: v5e
topology: v5e:2x2
jax: 0.10.0
libtpu: 0.0.40
codegen_flags: <defaults>
</compile_context>

<pallas_src>
import functools

import jax
import jax.numpy as jnp
from jax import lax
from jax.experimental import pallas as pl
from jax.experimental.pallas import tpu as pltpu


def _expand_kernel(x_ref, w_ref, b_ref, o_ref, *, H, W, K):
    # x_ref: (1, C, H*W)   raw image, spatial (H*W) on the lane axis
    # w_ref: (9, K, C)     fused per-tap weights; tap 4 (centre) also carries
    #                      the 1x1 branch in its rows [0:K1]
    # b_ref: (K, 1)        fused bias (f32)
    # o_ref: (1, K, H*W)   fused output == channel-concat of both ReLU branches
    HW = H * W
    x = x_ref[0]                                         # (C, HW), dot dtype

    # Spatial coordinates of every lane (computed once, reused by all taps).
    pos = lax.broadcasted_iota(jnp.int32, (1, HW), 1)
    if W & (W - 1) == 0:                                 # power-of-two width
        row = pos >> (W.bit_length() - 1)
        col = pos & (W - 1)
    else:
        row = pos // W
        col = pos - row * W

    # Bias folded into the accumulator init (no separate broadcast-add).
    acc = jnp.broadcast_to(b_ref[...], (K, HW)).astype(jnp.float32)

    for t in range(9):                                   # unrolled: 9 taps
        oy = t // 3 - 1
        ox = t % 3 - 1
        shift = (-(oy * W + ox)) % HW
        # tap[p] = x[p + oy*W + ox]  (circular; halo lanes masked below).
        xt = x if shift == 0 else pltpu.roll(x, shift=shift, axis=1)
        conds = []
        if oy < 0:
            conds.append(row >= -oy)
        elif oy > 0:
            conds.append(row < H - oy)
        if ox < 0:
            conds.append(col >= -ox)
        elif ox > 0:
            conds.append(col < W - ox)
        if conds:
            valid = functools.reduce(lambda a, b: a & b, conds)
            xt = jnp.where(valid, xt, jnp.zeros_like(xt))
        acc = acc + jnp.dot(w_ref[t], xt, preferred_element_type=jnp.float32)

    o_ref[0] = jnp.maximum(acc, 0.0).astype(o_ref.dtype)


def expand_layer(x_nchw, w1, b1, w3, b3, *, use_bf16=False):
    """x_nchw: (N, C, H, W); w1: (K1, C, 1, 1); w3: (K3, C, 3, 3); out: NCHW.

    use_bf16: feed bf16 operands to the MXU (v6e / v7x fast path); the
    accumulation, bias and ReLU stay f32.  Loosens parity vs. the f32
    reference to ~1e-2.
    """
    N, C, H, W = x_nchw.shape
    K1 = w1.shape[0]
    K3 = w3.shape[0]
    K = K1 + K3
    HW = H * W
    dot_dtype = jnp.bfloat16 if use_bf16 else jnp.float32

    # Lane-dense input: pure reshape — no transpose, no pad, no im2col.
    x_flat = x_nchw.reshape(N, C, HW).astype(dot_dtype)

    # Fused per-tap weights (9, K, C): rows [K1:] are the 3x3 taps; the 1x1
    # branch occupies rows [0:K1] of the centre tap (t = 4) only.
    w3_tap = jnp.transpose(w3, (2, 3, 0, 1)).reshape(9, K3, C)
    w1_tap = jnp.zeros((9, K1, C), w1.dtype).at[4].set(w1[:, :, 0, 0])
    w_comb = jnp.concatenate([w1_tap, w3_tap], axis=1).astype(dot_dtype)
    b_comb = jnp.concatenate([b1, b3]).reshape(K, 1).astype(jnp.float32)

    kernel = functools.partial(_expand_kernel, H=H, W=W, K=K)

    out = pl.pallas_call(
        kernel,
        out_shape=jax.ShapeDtypeStruct((N, K, HW), jnp.float32),
        grid=(N,),
        in_specs=[
            pl.BlockSpec((1, C, HW), lambda n: (n, 0, 0)),
            pl.BlockSpec((9, K, C), lambda n: (0, 0, 0)),
            pl.BlockSpec((K, 1), lambda n: (0, 0)),
        ],
        out_specs=pl.BlockSpec((1, K, HW), lambda n: (n, 0, 0)),
        compiler_params=pltpu.CompilerParams(
            dimension_semantics=("parallel",)),
    )(x_flat, w_comb, b_comb)

    # (N, K, H*W) -> (N, K, H, W): pure reshape, no transpose, no concat.
    return out.reshape(N, K, H, W)


expand_layer_jit = jax.jit(expand_layer, static_argnames=("use_bf16",))


def _reference(x, w1, b1, w3, b3):
    dn = ('NCHW', 'OIHW', 'NCHW')
    y1 = lax.conv_general_dilated(x, w1, (1, 1), 'VALID',
                                  dimension_numbers=dn) + b1[None, :, None, None]
    y3 = lax.conv_general_dilated(x, w3, (1, 1), ((1, 1), (1, 1)),
                                  dimension_numbers=dn) + b3[None, :, None, None]
    return jnp.concatenate([jnp.maximum(y1, 0.0), jnp.maximum(y3, 0.0)], axis=1)


if __name__ == "__main__":
    # Module hyperparameters (small, consistent with the forward pass).
    in_channels = 4
    out_channels_3x3 = 8
    out_channels_1x1 = 4   # present in __init__ but unused by the module's forward

    N, H, W = 2, 16, 16

    key = jax.random.PRNGKey(0)
    kx, kw1, kb1, kw3, kb3 = jax.random.split(key, 5)

    x = jax.random.normal(kx, (N, in_channels, H, W), dtype=jnp.float32)
    # Deterministic synthetic parameters (Conv2d weight layout: OIHW).
    w1 = 0.1 * jax.random.normal(kw1, (out_channels_3x3, in_channels, 1, 1), jnp.float32)
    b1 = 0.1 * jax.random.normal(kb1, (out_channels_3x3,), jnp.float32)
    w3 = 0.1 * jax.random.normal(kw3, (out_channels_3x3, in_channels, 3, 3), jnp.float32)
    b3 = 0.1 * jax.random.normal(kb3, (out_channels_3x3,), jnp.float32)

    ref = _reference(x, w1, b1, w3, b3)

    # Default f32 path: strict parity with the conv reference.
    out = jax.block_until_ready(expand_layer_jit(x, w1, b1, w3, b3))
    assert out.shape == (N, 2 * out_channels_3x3, H, W), out.shape
    assert jnp.allclose(out, ref, atol=1e-4, rtol=1e-4), "f32 mismatch vs reference conv"

    # Optional bf16-MXU-input path (v6e/v7x): tolerance loosened by design.
    out_bf16 = jax.block_until_ready(
        expand_layer_jit(x, w1, b1, w3, b3, use_bf16=True))
    assert jnp.allclose(out_bf16, ref, atol=5e-2, rtol=5e-2), \
        "bf16 mismatch vs reference conv"

    print("KERNEL_OK")
</pallas_src>

<mosaic_0001>
module attributes {stable_mosaic.version = 11 : i64} {
  func.func @_expand_kernel(%arg0: i32, %arg1: memref<1x4x256xf32, #tpu.memory_space<vmem>>, %arg2: memref<9x16x4xf32, #tpu.memory_space<vmem>>, %arg3: memref<16x1xf32, #tpu.memory_space<vmem>>, %arg4: memref<1x16x256xf32, #tpu.memory_space<vmem>>) attributes {dimension_semantics = [#tpu.dimension_semantics<parallel>], iteration_bounds = array<i64: 2>, scalar_prefetch = 0 : i64, scratch_operands = 0 : i64, tpu.core_type = #tpu.core_type<tc>, window_params = [{transform_indices = @transform_0, window_bounds = array<i64: 1, 4, 256>}, {pipeline_mode = #tpu.pipeline_mode<synchronous>, transform_indices = @transform_1, window_bounds = array<i64: 9, 16, 4>}, {pipeline_mode = #tpu.pipeline_mode<synchronous>, transform_indices = @transform_2, window_bounds = array<i64: 16, 1>}, {transform_indices = @transform_3, window_bounds = array<i64: 1, 16, 256>}]} {
    %c0 = arith.constant 0 : index
    %c0_0 = arith.constant 0 : index
    %c0_1 = arith.constant 0 : index
    %0 = vector.load %arg1[%c0, %c0_0, %c0_1] : memref<1x4x256xf32, #tpu.memory_space<vmem>>, vector<1x4x256xf32>
    %1 = vector.shape_cast %0 : vector<1x4x256xf32> to vector<4x256xf32>
    %2 = tpu.iota {dimensions = array<i32: 1>} : vector<1x256xi32>
    %c4_i32 = arith.constant 4 : i32
    %3 = vector.broadcast %c4_i32 : i32 to vector<1x256xi32>
    %4 = arith.shrsi %2, %3 : vector<1x256xi32>
    %c15_i32 = arith.constant 15 : i32
    %5 = vector.broadcast %c15_i32 : i32 to vector<1x256xi32>
    %6 = arith.andi %2, %5 : vector<1x256xi32>
    %c0_2 = arith.constant 0 : index
    %c0_3 = arith.constant 0 : index
    %7 = vector.load %arg3[%c0_2, %c0_3] : memref<16x1xf32, #tpu.memory_space<vmem>>, vector<16x1xf32>
    %8 = vector.shape_cast %7 : vector<16x1xf32> to vector<16x1xf32>
    %9 = vector.broadcast %8 : vector<16x1xf32> to vector<16x256xf32>
    %c17_i32 = arith.constant 17 : i32
    %10 = tpu.dynamic_rotate %1 by %c17_i32 dim 1 : vector<4x256xf32>, i32 -> vector<4x256xf32>
    %c1_i32 = arith.constant 1 : i32
    %11 = vector.broadcast %c1_i32 : i32 to vector<1x256xi32>
    %12 = arith.cmpi sge, %4, %11 : vector<1x256xi32>
    %c1_i32_4 = arith.constant 1 : i32
    %13 = vector.broadcast %c1_i32_4 : i32 to vector<1x256xi32>
    %14 = arith.cmpi sge, %6, %13 : vector<1x256xi32>
    %15 = arith.andi %12, %14 : vector<1x256xi1>
    %cst = arith.constant 0.000000e+00 : f32
    %16 = vector.broadcast %cst : f32 to vector<4x256xf32>
    %17 = vector.shape_cast %15 : vector<1x256xi1> to vector<1x256xi1>
    %18 = vector.broadcast %17 : vector<1x256xi1> to vector<4x256xi1>
    %19 = arith.select %18, %10, %16 : vector<4x256xi1>, vector<4x256xf32>
    %c0_5 = arith.constant 0 : index
    %c0_6 = arith.constant 0 : index
    %c0_7 = arith.constant 0 : index
    %20 = vector.load %arg2[%c0_5, %c0_6, %c0_7] : memref<9x16x4xf32, #tpu.memory_space<vmem>>, vector<1x16x4xf32>
    %21 = vector.shape_cast %20 : vector<1x16x4xf32> to vector<16x4xf32>
    %cst_8 = arith.constant dense<0.000000e+00> : vector<16x256xf32>
    %22 = tpu.matmul %21, %19, %cst_8 {dimension_numbers = #tpu.dot_dimension_numbers<[1], [0], [0], [1], [0, 0, 1, 1], [], []>} : vector<16x4xf32>, vector<4x256xf32>, vector<16x256xf32> -> vector<16x256xf32>
    %23 = arith.addf %9, %22 : vector<16x256xf32>
    %c16_i32 = arith.constant 16 : i32
    %24 = tpu.dynamic_rotate %1 by %c16_i32 dim 1 : vector<4x256xf32>, i32 -> vector<4x256xf32>
    %c1_i32_9 = arith.constant 1 : i32
    %25 = vector.broadcast %c1_i32_9 : i32 to vector<1x256xi32>
    %26 = arith.cmpi sge, %4, %25 : vector<1x256xi32>
    %cst_10 = arith.constant 0.000000e+00 : f32
    %27 = vector.broadcast %cst_10 : f32 to vector<4x256xf32>
    %28 = vector.shape_cast %26 : vector<1x256xi1> to vector<1x256xi1>
    %29 = vector.broadcast %28 : vector<1x256xi1> to vector<4x256xi1>
    %30 = arith.select %29, %24, %27 : vector<4x256xi1>, vector<4x256xf32>
    %c1 = arith.constant 1 : index
    %c0_11 = arith.constant 0 : index
    %c0_12 = arith.constant 0 : index
    %31 = vector.load %arg2[%c1, %c0_11, %c0_12] : memref<9x16x4xf32, #tpu.memory_space<vmem>>, vector<1x16x4xf32>
    %32 = vector.shape_cast %31 : vector<1x16x4xf32> to vector<16x4xf32>
    %cst_13 = arith.constant dense<0.000000e+00> : vector<16x256xf32>
    %33 = tpu.matmul %32, %30, %cst_13 {dimension_numbers = #tpu.dot_dimension_numbers<[1], [0], [0], [1], [0, 0, 1, 1], [], []>} : vector<16x4xf32>, vector<4x256xf32>, vector<16x256xf32> -> vector<16x256xf32>
    %34 = arith.addf %23, %33 : vector<16x256xf32>
    %c15_i32_14 = arith.constant 15 : i32
    %35 = tpu.dynamic_rotate %1 by %c15_i32_14 dim 1 : vector<4x256xf32>, i32 -> vector<4x256xf32>
    %c1_i32_15 = arith.constant 1 : i32
    %36 = vector.broadcast %c1_i32_15 : i32 to vector<1x256xi32>
    %37 = arith.cmpi sge, %4, %36 : vector<1x256xi32>
    %c15_i32_16 = arith.constant 15 : i32
    %38 = vector.broadcast %c15_i32_16 : i32 to vector<1x256xi32>
    %39 = arith.cmpi slt, %6, %38 : vector<1x256xi32>
    %40 = arith.andi %37, %39 : vector<1x256xi1>
    %cst_17 = arith.constant 0.000000e+00 : f32
    %41 = vector.broadcast %cst_17 : f32 to vector<4x256xf32>
    %42 = vector.shape_cast %40 : vector<1x256xi1> to vector<1x256xi1>
    %43 = vector.broadcast %42 : vector<1x256xi1> to vector<4x256xi1>
    %44 = arith.select %43, %35, %41 : vector<4x256xi1>, vector<4x256xf32>
    %c2 = arith.constant 2 : index
    %c0_18 = arith.constant 0 : index
    %c0_19 = arith.constant 0 : index
    %45 = vector.load %arg2[%c2, %c0_18, %c0_19] : memref<9x16x4xf32, #tpu.memory_space<vmem>>, vector<1x16x4xf32>
    %46 = vector.shape_cast %45 : vector<1x16x4xf32> to vector<16x4xf32>
    %cst_20 = arith.constant dense<0.000000e+00> : vector<16x256xf32>
    %47 = tpu.matmul %46, %44, %cst_20 {dimension_numbers = #tpu.dot_dimension_numbers<[1], [0], [0], [1], [0, 0, 1, 1], [], []>} : vector<16x4xf32>, vector<4x256xf32>, vector<16x256xf32> -> vector<16x256xf32>
    %48 = arith.addf %34, %47 : vector<16x256xf32>
    %c1_i32_21 = arith.constant 1 : i32
    %49 = tpu.dynamic_rotate %1 by %c1_i32_21 dim 1 : vector<4x256xf32>, i32 -> vector<4x256xf32>
    %c1_i32_22 = arith.constant 1 : i32
    %50 = vector.broadcast %c1_i32_22 : i32 to vector<1x256xi32>
    %51 = arith.cmpi sge, %6, %50 : vector<1x256xi32>
    %cst_23 = arith.constant 0.000000e+00 : f32
    %52 = vector.broadcast %cst_23 : f32 to vector<4x256xf32>
    %53 = vector.shape_cast %51 : vector<1x256xi1> to vector<1x256xi1>
    %54 = vector.broadcast %53 : vector<1x256xi1> to vector<4x256xi1>
    %55 = arith.select %54, %49, %52 : vector<4x256xi1>, vector<4x256xf32>
    %c3 = arith.constant 3 : index
    %c0_24 = arith.constant 0 : index
    %c0_25 = arith.constant 0 : index
    %56 = vector.load %arg2[%c3, %c0_24, %c0_25] : memref<9x16x4xf32, #tpu.memory_space<vmem>>, vector<1x16x4xf32>
    %57 = vector.shape_cast %56 : vector<1x16x4xf32> to vector<16x4xf32>
    %cst_26 = arith.constant dense<0.000000e+00> : vector<16x256xf32>
    %58 = tpu.matmul %57, %55, %cst_26 {dimension_numbers = #tpu.dot_dimension_numbers<[1], [0], [0], [1], [0, 0, 1, 1], [], []>} : vector<16x4xf32>, vector<4x256xf32>, vector<16x256xf32> -> vector<16x256xf32>
    %59 = arith.addf %48, %58 : vector<16x256xf32>
    %c4 = arith.constant 4 : index
    %c0_27 = arith.constant 0 : index
    %c0_28 = arith.constant 0 : index
    %60 = vector.load %arg2[%c4, %c0_27, %c0_28] : memref<9x16x4xf32, #tpu.memory_space<vmem>>, vector<1x16x4xf32>
    %61 = vector.shape_cast %60 : vector<1x16x4xf32> to vector<16x4xf32>
    %cst_29 = arith.constant dense<0.000000e+00> : vector<16x256xf32>
    %62 = tpu.matmul %61, %1, %cst_29 {dimension_numbers = #tpu.dot_dimension_numbers<[1], [0], [0], [1], [0, 0, 1, 1], [], []>} : vector<16x4xf32>, vector<4x256xf32>, vector<16x256xf32> -> vector<16x256xf32>
    %63 = arith.addf %59, %62 : vector<16x256xf32>
    %c255_i32 = arith.constant 255 : i32
    %64 = tpu.dynamic_rotate %1 by %c255_i32 dim 1 : vector<4x256xf32>, i32 -> vector<4x256xf32>
    %c15_i32_30 = arith.constant 15 : i32
    %65 = vector.broadcast %c15_i32_30 : i32 to vector<1x256xi32>
    %66 = arith.cmpi slt, %6, %65 : vector<1x256xi32>
    %cst_31 = arith.constant 0.000000e+00 : f32
    %67 = vector.broadcast %cst_31 : f32 to vector<4x256xf32>
    %68 = vector.shape_cast %66 : vector<1x256xi1> to vector<1x256xi1>
    %69 = vector.broadcast %68 : vector<1x256xi1> to vector<4x256xi1>
    %70 = arith.select %69, %64, %67 : vector<4x256xi1>, vector<4x256xf32>
    %c5 = arith.constant 5 : index
    %c0_32 = arith.constant 0 : index
    %c0_33 = arith.constant 0 : index
    %71 = vector.load %arg2[%c5, %c0_32, %c0_33] : memref<9x16x4xf32, #tpu.memory_space<vmem>>, vector<1x16x4xf32>
    %72 = vector.shape_cast %71 : vector<1x16x4xf32> to vector<16x4xf32>
    %cst_34 = arith.constant dense<0.000000e+00> : vector<16x256xf32>
    %73 = tpu.matmul %72, %70, %cst_34 {dimension_numbers = #tpu.dot_dimension_numbers<[1], [0], [0], [1], [0, 0, 1, 1], [], []>} : vector<16x4xf32>, vector<4x256xf32>, vector<16x256xf32> -> vector<16x256xf32>
    %74 = arith.addf %63, %73 : vector<16x256xf32>
    %c241_i32 = arith.constant 241 : i32
    %75 = tpu.dynamic_rotate %1 by %c241_i32 dim 1 : vector<4x256xf32>, i32 -> vector<4x256xf32>
    %c15_i32_35 = arith.constant 15 : i32
    %76 = vector.broadcast %c15_i32_35 : i32 to vector<1x256xi32>
    %77 = arith.cmpi slt, %4, %76 : vector<1x256xi32>
    %c1_i32_36 = arith.constant 1 : i32
    %78 = vector.broadcast %c1_i32_36 : i32 to vector<1x256xi32>
    %79 = arith.cmpi sge, %6, %78 : vector<1x256xi32>
    %80 = arith.andi %77, %79 : vector<1x256xi1>
    %cst_37 = arith.constant 0.000000e+00 : f32
    %81 = vector.broadcast %cst_37 : f32 to vector<4x256xf32>
    %82 = vector.shape_cast %80 : vector<1x256xi1> to vector<1x256xi1>
    %83 = vector.broadcast %82 : vector<1x256xi1> to vector<4x256xi1>
    %84 = arith.select %83, %75, %81 : vector<4x256xi1>, vector<4x256xf32>
    %c6 = arith.constant 6 : index
    %c0_38 = arith.constant 0 : index
    %c0_39 = arith.constant 0 : index
    %85 = vector.load %arg2[%c6, %c0_38, %c0_39] : memref<9x16x4xf32, #tpu.memory_space<vmem>>, vector<1x16x4xf32>
    %86 = vector.shape_cast %85 : vector<1x16x4xf32> to vector<16x4xf32>
    %cst_40 = arith.constant dense<0.000000e+00> : vector<16x256xf32>
    %87 = tpu.matmul %86, %84, %cst_40 {dimension_numbers = #tpu.dot_dimension_numbers<[1], [0], [0], [1], [0, 0, 1, 1], [], []>} : vector<16x4xf32>, vector<4x256xf32>, vector<16x256xf32> -> vector<16x256xf32>
    %88 = arith.addf %74, %87 : vector<16x256xf32>
    %c240_i32 = arith.constant 240 : i32
    %89 = tpu.dynamic_rotate %1 by %c240_i32 dim 1 : vector<4x256xf32>, i32 -> vector<4x256xf32>
    %c15_i32_41 = arith.constant 15 : i32
    %90 = vector.broadcast %c15_i32_41 : i32 to vector<1x256xi32>
    %91 = arith.cmpi slt, %4, %90 : vector<1x256xi32>
    %cst_42 = arith.constant 0.000000e+00 : f32
    %92 = vector.broadcast %cst_42 : f32 to vector<4x256xf32>
    %93 = vector.shape_cast %91 : vector<1x256xi1> to vector<1x256xi1>
    %94 = vector.broadcast %93 : vector<1x256xi1> to vector<4x256xi1>
    %95 = arith.select %94, %89, %92 : vector<4x256xi1>, vector<4x256xf32>
    %c7 = arith.constant 7 : index
    %c0_43 = arith.constant 0 : index
    %c0_44 = arith.constant 0 : index
    %96 = vector.load %arg2[%c7, %c0_43, %c0_44] : memref<9x16x4xf32, #tpu.memory_space<vmem>>, vector<1x16x4xf32>
    %97 = vector.shape_cast %96 : vector<1x16x4xf32> to vector<16x4xf32>
    %cst_45 = arith.constant dense<0.000000e+00> : vector<16x256xf32>
    %98 = tpu.matmul %97, %95, %cst_45 {dimension_numbers = #tpu.dot_dimension_numbers<[1], [0], [0], [1], [0, 0, 1, 1], [], []>} : vector<16x4xf32>, vector<4x256xf32>, vector<16x256xf32> -> vector<16x256xf32>
    %99 = arith.addf %88, %98 : vector<16x256xf32>
    %c239_i32 = arith.constant 239 : i32
    %100 = tpu.dynamic_rotate %1 by %c239_i32 dim 1 : vector<4x256xf32>, i32 -> vector<4x256xf32>
    %c15_i32_46 = arith.constant 15 : i32
    %101 = vector.broadcast %c15_i32_46 : i32 to vector<1x256xi32>
    %102 = arith.cmpi slt, %4, %101 : vector<1x256xi32>
    %c15_i32_47 = arith.constant 15 : i32
    %103 = vector.broadcast %c15_i32_47 : i32 to vector<1x256xi32>
    %104 = arith.cmpi slt, %6, %103 : vector<1x256xi32>
    %105 = arith.andi %102, %104 : vector<1x256xi1>
    %cst_48 = arith.constant 0.000000e+00 : f32
    %106 = vector.broadcast %cst_48 : f32 to vector<4x256xf32>
    %107 = vector.shape_cast %105 : vector<1x256xi1> to vector<1x256xi1>
    %108 = vector.broadcast %107 : vector<1x256xi1> to vector<4x256xi1>
    %109 = arith.select %108, %100, %106 : vector<4x256xi1>, vector<4x256xf32>
    %c8 = arith.constant 8 : index
    %c0_49 = arith.constant 0 : index
    %c0_50 = arith.constant 0 : index
    %110 = vector.load %arg2[%c8, %c0_49, %c0_50] : memref<9x16x4xf32, #tpu.memory_space<vmem>>, vector<1x16x4xf32>
    %111 = vector.shape_cast %110 : vector<1x16x4xf32> to vector<16x4xf32>
    %cst_51 = arith.constant dense<0.000000e+00> : vector<16x256xf32>
    %112 = tpu.matmul %111, %109, %cst_51 {dimension_numbers = #tpu.dot_dimension_numbers<[1], [0], [0], [1], [0, 0, 1, 1], [], []>} : vector<16x4xf32>, vector<4x256xf32>, vector<16x256xf32> -> vector<16x256xf32>
    %113 = arith.addf %99, %112 : vector<16x256xf32>
    %cst_52 = arith.constant 0.000000e+00 : f32
    %114 = vector.broadcast %cst_52 : f32 to vector<16x256xf32>
    %115 = arith.maximumf %113, %114 : vector<16x256xf32>
    %c0_53 = arith.constant 0 : index
    %c0_54 = arith.constant 0 : index
    %c0_55 = arith.constant 0 : index
    %116 = vector.load %arg4[%c0_53, %c0_54, %c0_55] : memref<1x16x256xf32, #tpu.memory_space<vmem>>, vector<1x16x256xf32>
    %117 = vector.shape_cast %116 : vector<1x16x256xf32> to vector<16x256xf32>
    %118 = vector.shape_cast %115 : vector<16x256xf32> to vector<1x16x256xf32>
    tpu.vector_store %arg4[%c0_53, %c0_54, %c0_55], %118 {strides = array<i32>} : memref<1x16x256xf32, #tpu.memory_space<vmem>>, vector<1x16x256xf32>,
    return
  }
  func.func @transform_0(%arg0: i32) -> (i32, i32, i32) {
    %c0_i32 = arith.constant 0 : i32
    %c0_i32_0 = arith.constant 0 : i32
    %c0_i32_1 = arith.constant 0 : i32
    return %arg0, %c0_i32, %c0_i32_0 : i32, i32, i32
  }
  func.func @transform_1(%arg0: i32) -> (i32, i32, i32) {
    %c0_i32 = arith.constant 0 : i32
    %c0_i32_0 = arith.constant 0 : i32
    %c0_i32_1 = arith.constant 0 : i32
    %c0_i32_2 = arith.constant 0 : i32
    return %c0_i32, %c0_i32_0, %c0_i32_1 : i32, i32, i32
  }
  func.func @transform_2(%arg0: i32) -> (i32, i32) {
    %c0_i32 = arith.constant 0 : i32
    %c0_i32_0 = arith.constant 0 : i32
    %c0_i32_1 = arith.constant 0 : i32
    return %c0_i32, %c0_i32_0 : i32, i32
  }
  func.func @transform_3(%arg0: i32) -> (i32, i32, i32) {
    %c0_i32 = arith.constant 0 : i32
    %c0_i32_0 = arith.constant 0 : i32
    %c0_i32_1 = arith.constant 0 : i32
    return %arg0, %c0_i32, %c0_i32_0 : i32, i32, i32
  }
}

</mosaic_0001>

<bundles_post_ra>
// kernel: expand_layer.1
= control target key start
LH: loop header
LB: loop body
LE: loop exit
PB: predicated region body
PF: predicated region fallthrough
CT: control target
= control target key end

     0   :  { %s1144_s12 = smov 0   ;;  %s1392_s0 = inlined_call_operand.vmem [shape: f32[2,4,256], index: 0, kind: input, shape index: {}]   ;;  %s1393_s1 = inlined_call_operand.vmem [shape: f32[9,16,4], index: 1, kind: input, shape index: {}]   ;;  %s1394_s2 = inlined_call_operand.vmem [shape: f32[16,1], index: 2, kind: input, shape index: {}]   ;;  %s1395_s3 = inlined_call_operand.vmem [shape: f32[2,16,256], index: 3, kind: output, shape index: {}]  }
   0x1 LB: > { %s1002_s13 = sadd.s32 4294967295, %s1113_s12   ;;  %p1006_p0 = scmp.ge.s32.totalorder %s1113_s12, 1  ;;  %s1113_s12 = sphi %s1144_s12, %s13_s12  }
   0x2   : > { %p137_p1 = scmp.lt.s32.totalorder %s1113_s12, 3 }
   0x4   : > { %p138_p2 = pnand %p1006_p0, %p137_p1 }
   0x5   : > { %p161_p3 = scmp.lt.s32.totalorder (!%p138_p2), %s1002_s13, 1  ;;  %s1115_s18 = smov (!%p138_p2), 17  }
   0x6   : > { %141 = sbr.rel (%p138_p2) target bundleno = 354 (0x162), region = 32  ;;  %s1116_s19 = smov (!%p138_p2), 16  }
   0x7   : > { %s1117_s20 = smov (!%p138_p2), 15   ;;  %s1118_s21 = smov (!%p138_p2), 1  }
   0x8   : > { %s1119_s22 = smov (!%p138_p2), 127   ;;  %s1120_s23 = smov (!%p138_p2), 113  }
   0x9   : > { %s1121_s24 = smov (!%p138_p2), 112   ;;  %s1122_s25 = smov (!%p138_p2), 111  }
   0xb   : > { %s1413_s13 = smov (!%p161_p3, %s1002_s13), 1  ;;  %v172_v19 = vlaneseq  ;;  %v1123_v27 = vmov 0   ;;  %v179_v28 = vld [vmem:[%s1394_s2] sm:$0xff]  ;;  %vm225_vm11 = vcmask 1043456   ;;  %v217_v45 = vld [vmem:[%s1393_s1 + $0x8] sm:$0xff]  ;;  %vm218_vm13 = vcmask 31744  }
   0xc   : > { %s1083_s14 = sshll.u32 %s1413_s13, 3  ;;  %1104 = vset.pattern.permute.xlu1 %v1123_v27  ;;  %1105 = vset.pattern.permute.xlu2 %v1123_v27  ;;  %v216_v48 = vld [vmem:[%s1393_s1] sm:$0xff]  ;;  %v1017_v54 = vld [vmem:[%s1393_s1 + $0x10] sm:$0xff]  ;;  %v180_v56 = vld [vmem:[%s1394_s2 + $0x8] sm:$0xff]  ;;  %s1084_s16 = sshll.u32 %s1413_s13, 5 }
   0xd   : > { %s165_s17 = scalar_lea.vmem %s1392_s0, %s1083_s14  ;;  %v1162_v20 = vand.u32 127, %v172_v19  ;;  %1106 = vset.pattern.permute.xlu0 %v1123_v27  ;;  %v1025_v55 = vld [vmem:[%s1393_s1 + $0x20] sm:$0xff]  ;;  %v1018_v63 = vld [vmem:[%s1393_s1 + $0x18] sm:$0xff]  ;;  %v1049_v19 = vld [vmem:[%s1393_s1 + $0x50] sm:$0xff] }
   0xe   : > { %v171_v0 = vld [vmem:[%s165_s17] sm:$0xff]  ;;  %v1065_v34 = vld [vmem:[%s1393_s1 + $0x70] sm:$0xff] }
   0xf   : > { %192 = vst [vmem:[#allocation1] ss:$2 sm:$0xff] %v171_v0  ;;  %v1165_v22 = vadd.s32 128, %v1162_v20  ;;  %v175_v23 = vshra.s32 %v1162_v20, 4  ;;  %v177_v24 = vand.u32 15, %v1162_v20  ;;  %vm374_vm6 = vcmp.lt.s32.totalorder %v1162_v20, 15 }
  0x10   : > { %vm201_vm8 = vcmp.lt.s32.totalorder %v1162_v20, 17  ;;  %vm291_vm14 = vcmp.lt.s32.totalorder %v1162_v20, 16  ;;  %vm461_vm15 = vcmp.lt.s32.totalorder %v1162_v20, 1  ;;  %v1073_v36 = vld [vmem:[%s1393_s1 + $0x80] sm:$0xff] }
  0x11   : > { %v176_v25 = vshra.s32 %v1165_v22, 4  ;;  %v178_v26 = vand.u32 15, %v1165_v22  ;;  %vm1176_vm0 = vcmp.ge.s32.totalorder %v175_v23, 1  ;;  %vm1180_vm1 = vcmp.ge.s32.totalorder %v177_v24, 1 }
  0x12   : > { %vm1194_vm4 = vcmp.lt.s32.totalorder %v177_v24, 15  ;;  %vm208_vm5 = vmand %vm1176_vm0, %vm1180_vm1 }
  0x13   : > { %vm1186_vm2 = vcmp.ge.s32.totalorder %v176_v25, 1  ;;  %vm1190_vm3 = vcmp.ge.s32.totalorder %v178_v26, 1  ;;  %vm1203_vm7 = vcmp.lt.s32.totalorder %v178_v26, 15  ;;  %vm379_vm10 = vmand %vm1176_vm0, %vm1194_vm4 }
  0x14   : > { %vm209_vm9 = vmand %vm1186_vm2, %vm1190_vm3 }
  0x15   : > { %vm380_vm12 = vmand %vm1186_vm2, %vm1203_vm7 }
  0x16   : > { %v193_v1 = vld.sshfl [vmem:[#allocation1] sm:$0xff pattern:$0x75316420]  ;;  %v194_v2 = vld.sshfl [vmem:[#allocation1 + $0x8] sm:$0xff pattern:$0x75316420] }
  0x17   : > { %197 = vrot.lane.b32.xlu0 %v193_v1, %s1115_s18  ;;  %282 = vst [vmem:[#allocation1] ss:$2 sm:$0xff] %v171_v0  ;;  %v1033_v1 = vld [vmem:[%s1393_s1 + $0x30] sm:$0xff] }
  0x1e   : > { %v283_v3 = vld.sshfl [vmem:[#allocation1] sm:$0xff pattern:$0x75316420]  ;;  %v284_v4 = vld.sshfl [vmem:[#allocation1 + $0x8] sm:$0xff pattern:$0x75316420] }
  0x1f   : > { %199 = vrot.lane.b32.xlu0 %v194_v2, %s1115_s18  ;;  %287 = vrot.lane.b32.xlu1 %v283_v3, %s1116_s19  ;;  %365 = vst [vmem:[#allocation1] ss:$2 sm:$0xff] %v171_v0  ;;  %v1041_v3 = vld [vmem:[%s1393_s1 + $0x40] sm:$0xff] }
  0x26   : > { %v366_v5 = vld.sshfl [vmem:[#allocation1] sm:$0xff pattern:$0x75316420]  ;;  %v367_v6 = vld.sshfl [vmem:[#allocation1 + $0x8] sm:$0xff pattern:$0x75316420] }
  0x27   : > { %289 = vrot.lane.b32.xlu1 %v284_v4, %s1116_s19  ;;  %452 = vst [vmem:[#allocation1] ss:$2 sm:$0xff] %v171_v0  ;;  %370 = vrot.lane.b32.xlu2 %v366_v5, %s1117_s20  ;;  %s170_s19 = scalar_lea.vmem %s1395_s3, %s1084_s16 }
  0x2e   : > { %v454_v7 = vld.sshfl [vmem:[#allocation1 + $0x8] sm:$0xff pattern:$0x75316420]  ;;  %v453_v8 = vld.sshfl [vmem:[#allocation1] sm:$0xff pattern:$0x75316420] }
  0x2f   : > { %459 = vrot.lane.b32.xlu1 %v454_v7, %s1118_s21  ;;  %457 = vrot.lane.b32.xlu0 %v453_v8, %s1118_s21  ;;  %538 = vst [vmem:[#allocation1] ss:$2 sm:$0xff] %v171_v0 }
  0x30   : > { %372 = vrot.lane.b32.xlu2 %v367_v6, %s1117_s20 }
  0x36   : > { %v1158_v9 = vld.sshfl [vmem:[#allocation1] sm:$0xff pattern:$0x75316420]  ;;  %v1160_v10 = vld.sshfl [vmem:[#allocation1 + $0x8] sm:$0xff pattern:$0x75316420] }
  0x37   : > { %601 = vst [vmem:[#allocation1] ss:$2 sm:$0xff] %v171_v0 }
  0x3e   : > { %v603_v11 = vld.sshfl [vmem:[#allocation1 + $0x8] sm:$0xff pattern:$0x75316420]  ;;  %v602_v12 = vld.sshfl [vmem:[#allocation1] sm:$0xff pattern:$0x75316420] }
  0x3f   : > { %608 = vrot.lane.b32.xlu0 %v603_v11, %s1119_s22  ;;  %684 = vst [vmem:[#allocation1] ss:$2 sm:$0xff] %v171_v0  ;;  %606 = vrot.lane.b32.xlu2 %v602_v12, %s1119_s22  ;;  %v1042_v12 = vld [vmem:[%s1393_s1 + $0x48] sm:$0xff] }
  0x46   : > { %v685_v13 = vld.sshfl [vmem:[#allocation1] sm:$0xff pattern:$0x75316420]  ;;  %v686_v14 = vld.sshfl [vmem:[#allocation1 + $0x8] sm:$0xff pattern:$0x75316420] }
  0x47   : > { %689 = vrot.lane.b32.xlu1 %v685_v13, %s1120_s23  ;;  %771 = vst [vmem:[#allocation1] ss:$2 sm:$0xff] %v171_v0  ;;  %691 = vrot.lane.b32.xlu2 %v686_v14, %s1120_s23 }
  0x4e   : > { %v773_v15 = vld.sshfl [vmem:[#allocation1 + $0x8] sm:$0xff pattern:$0x75316420]  ;;  %v772_v16 = vld.sshfl [vmem:[#allocation1] sm:$0xff pattern:$0x75316420] }
  0x4f   : > { %778 = vrot.lane.b32.xlu1 %v773_v15, %s1121_s24  ;;  %776 = vrot.lane.b32.xlu0 %v772_v16, %s1121_s24  ;;  %854 = vst [vmem:[#allocation1] ss:$2 sm:$0xff] %v171_v0  ;;  %v1026_v0 = vld [vmem:[%s1393_s1 + $0x28] sm:$0xff] }
  0x56   : > { %v856_v17 = vld.sshfl [vmem:[#allocation1 + $0x8] sm:$0xff pattern:$0x75316420]  ;;  %v855_v18 = vld.sshfl [vmem:[#allocation1] sm:$0xff pattern:$0x75316420] }
  0x57   : > { %861 = vrot.lane.b32.xlu0 %v856_v17, %s1122_s25  ;;  %859 = vrot.lane.b32.xlu2 %v855_v18, %s1122_s25 }
  0x58   : > { %183 = vperm.xlu1 %1104, %v179_v28   ;;  %v1050_v28 = vld [vmem:[%s1393_s1 + $0x58] sm:$0xff] }
  0x5f   : > { %188 = vperm.xlu2 %1105, %v180_v56  }
  0x81   : > { %v371_v21 = vpop.permute.xlu2 %370 }
  0x89   : > { %v198_v29 = vpop.permute.xlu0 %197 }
  0x8a   : > { %v373_v35 = vpop.permute.xlu2 %372 }
  0x8b   : > { %v375_v39 = vsel %vm374_vm6, %v371_v21, %v373_v35  ;;  %v376_v40 = vsel %vm374_vm6, %v373_v35, %v371_v21  ;;  %vm693_vm6 = vcmp.lt.s32.totalorder %v1162_v20, 113  ;;  %v1057_v21 = vld [vmem:[%s1393_s1 + $0x60] sm:$0xff] }
  0x8c   : > { %v385_v46 = vsel %vm379_vm10, %v376_v40, 0.0  ;;  %v386_v47 = vsel %vm380_vm12, %v375_v39, 0.0 }
  0x91   : > { %v200_v37 = vpop.permute.xlu0 %199  ;;  %v288_v38 = vpop.permute.xlu1 %287 }
  0x92   : > { %v203_v41 = vsel %vm201_vm8, %v200_v37, %v198_v29  ;;  %v202_v42 = vsel %vm201_vm8, %v198_v29, %v200_v37  ;;  %v1058_v29 = vld [vmem:[%s1393_s1 + $0x68] sm:$0xff]  ;;  %v1066_v37 = vld [vmem:[%s1393_s1 + $0x78] sm:$0xff] }
  0x93   : > { %v214_v43 = vsel %vm208_vm5, %v203_v41, 0.0  ;;  %v215_v44 = vsel %vm209_vm9, %v202_v42, 0.0  ;;  %vm1305_vm5 = vcmp.lt.s32.totalorder %v176_v25, 15 }
  0x94   : > { %1011 = vmatpush.msk.msra.mxu0 %vm225_vm11, %v214_v43  ;;  %1085 = vmatpush.msk.msra.mxu2 %vm225_vm11, %v214_v43  ;;  %vm699_vm9 = vmand %vm1305_vm5, %vm1190_vm3 }
  0x95   : > { %1014 = vmatpush.msk.msra.mxu1 %vm225_vm11, %v215_v44  ;;  %1086 = vmatpush.msk.msra.mxu3 %vm225_vm11, %v215_v44  ;;  %vm867_vm12 = vmand %vm1305_vm5, %vm1203_vm7 }
  0x96   : > { %1013 = vmatmul.msk.f32.vlgmr.msra.gmra.mxu2 %vm218_vm13, %v217_v45  ;;  %1016 = vmatmul.msk.f32.vlgmr.msra.gmra.mxu3 %vm218_vm13, %v217_v45 }
  0x97   : > { %1027 = vmatpush.msk.msrb.mxu0 %vm225_vm11, %v385_v46  ;;  %1030 = vmatpush.msk.msrb.mxu1 %vm225_vm11, %v386_v47 }
  0x98   : > { %1012 = vmatmul.msk.f32.vlgmr.msra.gmra.mxu0 %vm218_vm13, %v216_v48  ;;  %1015 = vmatmul.msk.f32.vlgmr.msra.gmra.mxu1 %vm218_vm13, %v216_v48 }
  0x99   : > { %v290_v49 = vpop.permute.xlu1 %289  ;;  %1043 = vmatpush.msk.msra.mxu0 %vm225_vm11, %v1158_v9  ;;  %1046 = vmatpush.msk.msra.mxu1 %vm225_vm11, %v1160_v10  ;;  %v607_v2 = vpop.permute.xlu2 %606  ;;  %v1034_v9 = vld [vmem:[%s1393_s1 + $0x38] sm:$0xff] }
  0x9a   : > { %v292_v50 = vsel %vm291_vm14, %v288_v38, %v290_v49  ;;  %v293_v51 = vsel %vm291_vm14, %v290_v49, %v288_v38  ;;  %v1074_v38 = vld [vmem:[%s1393_s1 + $0x88] sm:$0xff] }
  0x9b   : > { %v298_v52 = vsel %vm1176_vm0, %v293_v51, 0.0  ;;  %v299_v53 = vsel %vm1186_vm2, %v292_v50, 0.0  ;;  %vm610_vm0 = vcmp.lt.s32.totalorder %v1162_v20, 127  ;;  %vm1299_vm2 = vcmp.lt.s32.totalorder %v175_v23, 15 }
  0x9c   : > { %1019 = vmatpush.msk.msrb.mxu2 %vm225_vm11, %v298_v52  ;;  %1022 = vmatpush.msk.msrb.mxu3 %vm225_vm11, %v299_v53  ;;  %vm698_vm8 = vmand %vm1299_vm2, %vm1180_vm1 }
  0x9d   : > { %vm866_vm10 = vmand %vm1299_vm2, %vm1194_vm4 }
  0x9e   : > { %1020 = vmatmul.msk.f32.vlgmr.msrb.gmra.mxu2 %vm218_vm13, %v1017_v54  ;;  %1023 = vmatmul.msk.f32.vlgmr.msrb.gmra.mxu3 %vm218_vm13, %v1017_v54 }
  0xa0   : > { %1028 = vmatmul.msk.f32.vlgmr.msrb.gmra.mxu0 %vm218_vm13, %v1025_v55  ;;  %1031 = vmatmul.msk.f32.vlgmr.msrb.gmra.mxu1 %vm218_vm13, %v1025_v55 }
  0xa1   : > { %v460_v57 = vpop.permute.xlu1 %459  ;;  %v458_v58 = vpop.permute.xlu0 %457 }
  0xa2   : > { %v462_v59 = vsel %vm461_vm15, %v458_v58, %v460_v57  ;;  %v463_v60 = vsel %vm461_vm15, %v460_v57, %v458_v58  ;;  %v692_v13 = vpop.permute.xlu2 %691 }
  0xa3   : > { %v468_v61 = vsel %vm1180_vm1, %v463_v60, 0.0  ;;  %v469_v62 = vsel %vm1190_vm3, %v462_v59, 0.0  ;;  %vm780_vm1 = vcmp.lt.s32.totalorder %v1162_v20, 112  ;;  %vm863_vm3 = vcmp.lt.s32.totalorder %v1162_v20, 111 }
  0xa4   : > { %1035 = vmatpush.msk.msra.mxu2 %vm225_vm11, %v468_v61  ;;  %1038 = vmatpush.msk.msra.mxu3 %vm225_vm11, %v469_v62 }
  0xa6   : > { %1021 = vmatmul.msk.f32.gmra.mxu2 %vm218_vm13, %v1018_v63  ;;  %1024 = vmatmul.msk.f32.gmra.mxu3 %vm218_vm13, %v1018_v63 }
  0xa8   : > { %1029 = vmatmul.msk.f32.gmra.mxu0 %vm218_vm13, %v1026_v0  ;;  %1032 = vmatmul.msk.f32.gmra.mxu1 %vm218_vm13, %v1026_v0 }
  0xae   : > { %1036 = vmatmul.msk.f32.vlgmr.msra.gmra.mxu2 %vm218_vm13, %v1033_v1  ;;  %1039 = vmatmul.msk.f32.vlgmr.msra.gmra.mxu3 %vm218_vm13, %v1033_v1 }
  0xb0   : > { %1044 = vmatmul.msk.f32.vlgmr.msra.gmra.mxu0 %vm218_vm13, %v1041_v3  ;;  %1047 = vmatmul.msk.f32.vlgmr.msra.gmra.mxu1 %vm218_vm13, %v1041_v3 }
  0xb1   : > { %v609_v4 = vpop.permute.xlu0 %608  ;;  %v860_v30 = vpop.permute.xlu2 %859 }
  0xb2   : > { %v611_v5 = vsel %vm610_vm0, %v607_v2, %v609_v4  ;;  %v612_v6 = vsel %vm610_vm0, %v609_v4, %v607_v2 }
  0xb3   : > { %v617_v7 = vsel %vm1194_vm4, %v611_v5, 0.0  ;;  %v618_v8 = vsel %vm1203_vm7, %v612_v6, 0.0 }
  0xb4   : > { %1051 = vmatpush.msk.msrb.mxu2 %vm225_vm11, %v617_v7  ;;  %1054 = vmatpush.msk.msrb.mxu3 %vm225_vm11, %v618_v8 }
  0xb6   : > { %1037 = vmatmul.msk.f32.gmra.mxu2 %vm218_vm13, %v1034_v9  ;;  %1040 = vmatmul.msk.f32.gmra.mxu3 %vm218_vm13, %v1034_v9 }
  0xb8   : > { %1045 = vmatmul.msk.f32.gmra.mxu0 %vm218_vm13, %v1042_v12  ;;  %1048 = vmatmul.msk.f32.gmra.mxu1 %vm218_vm13, %v1042_v12 }
  0xb9   : > { %v690_v14 = vpop.permute.xlu1 %689  ;;  %v189_v4 = vpop.permute.xlu2 %188 }
  0xba   : > { %v694_v15 = vsel %vm693_vm6, %v690_v14, %v692_v13  ;;  %v695_v16 = vsel %vm693_vm6, %v692_v13, %v690_v14 }
  0xbb   : > { %v704_v17 = vsel %vm698_vm8, %v694_v15, 0.0  ;;  %v705_v18 = vsel %vm699_vm9, %v695_v16, 0.0 }
  0xbc   : > { %1059 = vmatpush.msk.msrb.mxu0 %vm225_vm11, %v704_v17  ;;  %1062 = vmatpush.msk.msrb.mxu1 %vm225_vm11, %v705_v18 }
  0xbe   : > { %1052 = vmatmul.msk.f32.vlgmr.msrb.gmra.mxu2 %vm218_vm13, %v1049_v19  ;;  %1055 = vmatmul.msk.f32.vlgmr.msrb.gmra.mxu3 %vm218_vm13, %v1049_v19 }
  0xc0   : > { %1063 = vmatmul.msk.f32.vlgmr.msrb.gmra.mxu1 %vm218_vm13, %v1057_v21  ;;  %1060 = vmatmul.msk.f32.vlgmr.msrb.gmra.mxu0 %vm218_vm13, %v1057_v21 }
  0xc1   : > { %v779_v22 = vpop.permute.xlu1 %778  ;;  %v777_v23 = vpop.permute.xlu0 %776 }
  0xc2   : > { %v781_v24 = vsel %vm780_vm1, %v777_v23, %v779_v22  ;;  %v782_v25 = vsel %vm780_vm1, %v779_v22, %v777_v23 }
  0xc3   : > { %v787_v26 = vsel %vm1299_vm2, %v781_v24, 0.0  ;;  %v788_v27 = vsel %vm1305_vm5, %v782_v25, 0.0 }
  0xc4   : > { %1067 = vmatpush.msk.msra.mxu2 %vm225_vm11, %v787_v26  ;;  %1070 = vmatpush.msk.msra.mxu3 %vm225_vm11, %v788_v27 }
  0xc6   : > { %1053 = vmatmul.msk.f32.gmra.mxu2 %vm218_vm13, %v1050_v28  ;;  %1056 = vmatmul.msk.f32.gmra.mxu3 %vm218_vm13, %v1050_v28 }
  0xc8   : > { %1061 = vmatmul.msk.f32.gmra.mxu0 %vm218_vm13, %v1058_v29  ;;  %1064 = vmatmul.msk.f32.gmra.mxu1 %vm218_vm13, %v1058_v29 }
  0xc9   : > { %v862_v31 = vpop.permute.xlu0 %861 }
  0xca   : > { %v864_v32 = vsel %vm863_vm3, %v860_v30, %v862_v31  ;;  %v865_v33 = vsel %vm863_vm3, %v862_v31, %v860_v30  ;;  %v184_v59 = vpop.permute.xlu1 %183 }
  0xcb   : > { %v872_v35 = vsel %vm866_vm10, %v864_v32, 0.0  ;;  %v873_v20 = vsel %vm867_vm12, %v865_v33, 0.0 }
  0xcc   : > { %1075 = vmatpush.msk.msra.mxu0 %vm225_vm11, %v872_v35  ;;  %1078 = vmatpush.msk.msra.mxu1 %vm225_vm11, %v873_v20 }
  0xce   : > { %1068 = vmatmul.msk.f32.vlgmr.msra.gmra.mxu2 %vm218_vm13, %v1065_v34  ;;  %1071 = vmatmul.msk.f32.vlgmr.msra.gmra.mxu3 %vm218_vm13, %v1065_v34 }
  0xd0   : > { %1076 = vmatmul.msk.f32.vlgmr.msra.gmra.mxu0 %vm218_vm13, %v1073_v36  ;;  %1079 = vmatmul.msk.f32.vlgmr.msra.gmra.mxu1 %vm218_vm13, %v1073_v36 }
  0xd6   : > { %1069 = vmatmul.msk.f32.gmra.mxu2 %vm218_vm13, %v1066_v37  ;;  %1072 = vmatmul.msk.f32.gmra.mxu3 %vm218_vm13, %v1066_v37 }
  0xd8   : > { %1077 = vmatmul.msk.f32.gmra.mxu0 %vm218_vm13, %v1074_v38  ;;  %1080 = vmatmul.msk.f32.gmra.mxu1 %vm218_vm13, %v1074_v38 }
 0x115   : > { %v249_v39 = vpop.f32.mrf.mxu0  ;;  %v272_v40 = vpop.f32.mrf.mxu1 }
 0x116   : > { %v278_v62 = vadd.f32 %v249_v39, %v184_v59  ;;  %v279_v63 = vadd.f32 %v272_v40, %v184_v59 }
 0x119   : > { %v252_v41 = vpop.f32.mrf.mxu2  ;;  %v275_v42 = vpop.f32.mrf.mxu3 }
 0x11a   : > { %v280_v9 = vadd.f32 %v252_v41, %v189_v4  ;;  %v281_v10 = vadd.f32 %v275_v42, %v189_v4 }
 0x11d   : > { %v419_v43 = vpop.f32.mrf.mxu0  ;;  %v442_v44 = vpop.f32.mrf.mxu1 }
 0x121   : > { %v332_v45 = vpop.f32.mrf.mxu2  ;;  %v355_v46 = vpop.f32.mrf.mxu3 }
 0x122   : > { %v361_v0 = vadd.f32 %v332_v45, %v278_v62  ;;  %v362_v1 = vadd.f32 %v355_v46, %v279_v63 }
 0x124   : > { %v448_v5 = vadd.f32 %v419_v43, %v361_v0  ;;  %v449_v6 = vadd.f32 %v442_v44, %v362_v1 }
 0x125   : > { %v422_v47 = vpop.f32.mrf.mxu0  ;;  %v445_v48 = vpop.f32.mrf.mxu1 }
 0x129   : > { %v335_v49 = vpop.f32.mrf.mxu2  ;;  %v358_v50 = vpop.f32.mrf.mxu3 }
 0x12a   : > { %v363_v13 = vadd.f32 %v335_v49, %v280_v9  ;;  %v364_v14 = vadd.f32 %v358_v50, %v281_v10 }
 0x12c   : > { %v450_v19 = vadd.f32 %v422_v47, %v363_v13  ;;  %v451_v21 = vadd.f32 %v445_v48, %v364_v14 }
 0x12d   : > { %v568_v51 = vpop.f32.mrf.mxu0  ;;  %v591_v52 = vpop.f32.mrf.mxu1 }
 0x131   : > { %v502_v53 = vpop.f32.mrf.mxu2  ;;  %v525_v54 = vpop.f32.mrf.mxu3 }
 0x132   : > { %v531_v11 = vadd.f32 %v502_v53, %v448_v5  ;;  %v532_v12 = vadd.f32 %v525_v54, %v449_v6 }
 0x134   : > { %v597_v17 = vadd.f32 %v568_v51, %v531_v11  ;;  %v598_v18 = vadd.f32 %v591_v52, %v532_v12 }
 0x135   : > { %v571_v55 = vpop.f32.mrf.mxu0  ;;  %v594_v56 = vpop.f32.mrf.mxu1 }
 0x139   : > { %v505_v57 = vpop.f32.mrf.mxu2  ;;  %v528_v58 = vpop.f32.mrf.mxu3 }
 0x13a   : > { %v533_v24 = vadd.f32 %v505_v57, %v450_v19  ;;  %v534_v25 = vadd.f32 %v528_v58, %v451_v21 }
 0x13c   : > { %v599_v32 = vadd.f32 %v571_v55, %v533_v24  ;;  %v600_v33 = vadd.f32 %v594_v56, %v534_v25 }
 0x13d   : > { %v738_v60 = vpop.f32.mrf.mxu0  ;;  %v761_v61 = vpop.f32.mrf.mxu1 }
 0x141   : > { %v651_v2 = vpop.f32.mrf.mxu2  ;;  %v674_v3 = vpop.f32.mrf.mxu3 }
 0x142   : > { %v680_v22 = vadd.f32 %v651_v2, %v597_v17  ;;  %v681_v23 = vadd.f32 %v674_v3, %v598_v18 }
 0x144   : > { %v767_v28 = vadd.f32 %v738_v60, %v680_v22  ;;  %v768_v29 = vadd.f32 %v761_v61, %v681_v23 }
 0x145   : > { %v741_v7 = vpop.f32.mrf.mxu0  ;;  %v764_v8 = vpop.f32.mrf.mxu1 }
 0x149   : > { %v654_v15 = vpop.f32.mrf.mxu2  ;;  %v677_v16 = vpop.f32.mrf.mxu3 }
 0x14a   : > { %v682_v34 = vadd.f32 %v654_v15, %v599_v32  ;;  %v683_v36 = vadd.f32 %v677_v16, %v600_v33 }
 0x14c   : > { %v769_v41 = vadd.f32 %v741_v7, %v682_v34  ;;  %v770_v42 = vadd.f32 %v764_v8, %v683_v36 }
 0x14d   : > { %v906_v26 = vpop.f32.mrf.mxu0  ;;  %v929_v27 = vpop.f32.mrf.mxu1 }
 0x151   : > { %v821_v30 = vpop.f32.mrf.mxu2  ;;  %v844_v31 = vpop.f32.mrf.mxu3 }
 0x152   : > { %v850_v35 = vadd.f32 %v821_v30, %v767_v28  ;;  %v851_v20 = vadd.f32 %v844_v31, %v768_v29 }
 0x154   : > { %v935_v37 = vadd.f32 %v906_v26, %v850_v35  ;;  %v936_v38 = vadd.f32 %v929_v27, %v851_v20 }
 0x155   : > { %v909_v43 = vpop.f32.mrf.mxu0  ;;  %v932_v44 = vpop.f32.mrf.mxu1 }
 0x156   : > { %v939_v39 = vmax.f32 %v935_v37, 0.0  ;;  %v940_v40 = vmax.f32 %v936_v38, 0.0 }
 0x158   : > { %943 = vst [vmem:[%s170_s19] sm:$0xff] %v939_v39 }
 0x159   : > { %944 = vst [vmem:[%s170_s19 + $0x8] sm:$0xff] %v940_v40  ;;  %v824_v45 = vpop.f32.mrf.mxu2  ;;  %v847_v46 = vpop.f32.mrf.mxu3 }
 0x15a   : > { %v852_v47 = vadd.f32 %v824_v45, %v769_v41  ;;  %v853_v48 = vadd.f32 %v847_v46, %v770_v42 }
 0x15c   : > { %v937_v49 = vadd.f32 %v909_v43, %v852_v47  ;;  %v938_v50 = vadd.f32 %v932_v44, %v853_v48 }
 0x15e   : > { %v941_v51 = vmax.f32 %v937_v49, 0.0  ;;  %v942_v52 = vmax.f32 %v938_v50, 0.0 }
 0x160   : > { %945 = vst [vmem:[%s170_s19 + $0x10] sm:$0xff] %v941_v51 }
 0x161   : > { %946 = vst [vmem:[%s170_s19 + $0x18] sm:$0xff] %v942_v52 }
 0x162 PF: > { %s13_s12 = sadd.s32 1, %s1113_s12  }
 0x163   : > { %p10_p4 = scmp.ge.s32.totalorder %s13_s12, 4  }
 0x165   :  { %12 = sbr.rel (!%p10_p4) target bundleno = 1 (0x1), region = 70 }

</bundles_post_ra>
